<compile_context>
chip_gen: v6e
topology: v6e:2x2x1
jax: 0.10.0
libtpu: 0.0.40
codegen_flags: <defaults>
</compile_context>

<pallas_src>
import jax
import jax.numpy as jnp
from jax import lax
from jax.experimental import pallas as pl
from jax.experimental.pallas import tpu as pltpu


def _round_up(n, m):
    return ((n + m - 1) // m) * m


# Contract the last dim of both operands (A @ B.T) — the NT orientation used by
# the production flash-attention TPU kernel; avoids an explicit x transpose.
_NT_DIM_NUMBERS = (((1,), (1,)), ((), ()))


def mlp_kernel(x_ref, w1t_ref, w2t_ref, c_ref, o_ref):
    # x_ref: (Bt, in) f32 in natural layout; cast to bf16 in-kernel so the
    # wrapper never writes a transposed/bf16 copy of x back to HBM.
    xb = x_ref[...].astype(jnp.bfloat16)                   # (Bt, in) bf16

    # Packed constants: col0 = b1 (rows 0..63), col1 = b2, col2 = w3@w4,
    # col3[0] = fused bias b3@w4 + b4.
    b1 = c_ref[0:64, 0:1]                                  # (64, 1)  f32
    b2 = c_ref[:, 1:2]                                     # (128, 1) f32
    w34 = c_ref[:, 2:3]                                    # (128, 1) f32
    b34 = c_ref[0:1, 3:4]                                  # (1, 1)   f32

    # Layer 1 (NT): (64, in) x (Bt, in)^T -> (64, Bt); bf16 MXU operands, f32 acc.
    h1 = lax.dot_general(w1t_ref[...], xb, _NT_DIM_NUMBERS,
                         preferred_element_type=jnp.float32)
    h1 = jnp.maximum(h1 + b1, 0.0)                         # ReLU(f1), f32 VPU (lane-splat bias)

    # Layer 2: (128, 64) @ (64, Bt) -> (128, Bt).
    h2 = jnp.dot(w2t_ref[...], h1.astype(jnp.bfloat16),
                 preferred_element_type=jnp.float32)
    h2 = jnp.maximum(h2 + b2, 0.0)                         # ReLU(f2), f32 VPU

    # Fused layers 3+4: 128 -> 1 projection as an f32 sublane reduce (VPU/XLU),
    # keeping the MXU free of a 1-wide matmul; output stays lane-dense (1, Bt).
    out = jnp.sum(h2 * w34, axis=0, keepdims=True) + b34
    o_ref[...] = out.astype(o_ref.dtype)


def simple_conv_net_forward(x, params, block_b=8192):
    """Forward pass of SimpleConvNet. x: (B, in_size) f32 -> (B, 1) f32."""
    w1, b1, w2, b2, w3, b3, w4, b4 = params
    B, in_size = x.shape

    # Fuse the activation-free layers 3 and 4 (exact up to fp reassociation).
    w34 = (w3 @ w4).reshape(-1)                       # (128,) f32
    b34 = (b3 @ w4 + b4).reshape(())                  # scalar f32

    # Pack the four tiny constant operands into one (128, 4) f32 tile.
    consts = jnp.zeros((128, 4), jnp.float32)
    consts = consts.at[0:64, 0].set(b1.reshape(-1))
    consts = consts.at[:, 1].set(b2.reshape(-1))
    consts = consts.at[:, 2].set(w34)
    consts = consts.at[0, 3].set(b34)

    # bf16 MXU weight operands (tiny; biases stay f32 inside `consts`).
    w1t = w1.T.astype(jnp.bfloat16)                   # (64, in)  bf16
    w2t = w2.T.astype(jnp.bfloat16)                   # (128, 64) bf16

    # Batch tile: large enough to amortize the ~0.35us/grid-step pipeline cost,
    # capped at ceil(B/2) rounded to 128 lanes so v7x's two TensorCores both get
    # at least one tile of the "parallel" batch axis.
    b_ceil = _round_up(B, 128)
    b_half = _round_up((B + 1) // 2, 128)
    Bt = max(128, min(block_b, b_ceil, b_half))
    B_pad = _round_up(B, Bt)
    n_tiles = B_pad // Bt

    if B_pad != B:
        # Padded (zero) rows flow through and produce bias-only garbage columns
        # that are sliced off below; nothing reduces over batch in-kernel.
        x = jnp.pad(x, ((0, B_pad - B), (0, 0)))

    # Intermediates are ~0.75 KiB/batch-elem (h1 + h2 in f32); only raise the
    # scoped-VMEM limit when the large tile might exceed v5e's 16 MiB default.
    vmem_limit = 48 * 1024 * 1024 if Bt >= 2048 else None

    const = lambda i: (0, 0)                          # weights/consts stay VMEM-resident
    out = pl.pallas_call(
        mlp_kernel,
        out_shape=jax.ShapeDtypeStruct((1, B_pad), jnp.float32),
        grid_spec=pltpu.PrefetchScalarGridSpec(
            num_scalar_prefetch=0,
            grid=(n_tiles,),
            in_specs=[
                pl.BlockSpec((Bt, in_size), lambda i: (i, 0)),   # x tile, natural layout
                pl.BlockSpec((64, in_size), const),              # w1^T (bf16)
                pl.BlockSpec((128, 64), const),                  # w2^T (bf16)
                pl.BlockSpec((128, 4), const),                   # packed b1 | b2 | w3@w4 | b34
            ],
            out_specs=pl.BlockSpec((1, Bt), lambda i: (0, i)),   # lane-dense output slab
        ),
        compiler_params=pltpu.CompilerParams(
            dimension_semantics=("parallel",),
            vmem_limit_bytes=vmem_limit,
        ),
    )(x, w1t, w2t, consts)

    # Lane-dense (1, B_pad) slab -> (B, 1) column, dropping batch padding.
    return out[0, :B].reshape(B, 1)


def init_params(key, in_size=16):
    # Deterministic init mimicking PyTorch Linear default:
    # U(-1/sqrt(fan_in), 1/sqrt(fan_in)) for both weight and bias.
    dims = [(in_size, 64), (64, 128), (128, 128), (128, 1)]
    params = []
    for (fan_in, fan_out) in dims:
        key, kw, kb = jax.random.split(key, 3)
        bound = 1.0 / jnp.sqrt(jnp.float32(fan_in))
        w = jax.random.uniform(kw, (fan_in, fan_out), jnp.float32, -bound, bound)
        b = jax.random.uniform(kb, (1, fan_out), jnp.float32, -bound, bound)
        params += [w, b]
    return tuple(params)


def reference_forward_f32(x, params):
    # PyTorch-faithful f32 reference (no fusion, no bf16 casts).
    w1, b1, w2, b2, w3, b3, w4, b4 = params
    h = jax.nn.relu(x @ w1 + b1)
    h = jax.nn.relu(h @ w2 + b2)
    h = h @ w3 + b3
    return h @ w4 + b4


def reference_forward_matched(x, params):
    # Precision-matched reference: same bf16 MXU operands / f32 accumulation
    # and the same layer-3/4 fusion as the kernel.
    w1, b1, w2, b2, w3, b3, w4, b4 = params
    w34 = w3 @ w4
    b34 = b3 @ w4 + b4
    h1 = jnp.maximum(jnp.dot(x.astype(jnp.bfloat16), w1.astype(jnp.bfloat16),
                             preferred_element_type=jnp.float32) + b1, 0.0)
    h2 = jnp.maximum(jnp.dot(h1.astype(jnp.bfloat16), w2.astype(jnp.bfloat16),
                             preferred_element_type=jnp.float32) + b2, 0.0)
    return h2 @ w34 + b34


if __name__ == "__main__":
    key = jax.random.PRNGKey(0)
    key_x, key_x2, key_p = jax.random.split(key, 3)
    B, IN = 8, 16
    x = jax.random.normal(key_x, (B, IN), dtype=jnp.float32)
    params = init_params(key_p, in_size=IN)

    out = simple_conv_net_forward(x, params)
    out = jax.block_until_ready(out)
    assert out.shape == (B, 1)

    ref_matched = reference_forward_matched(x, params)
    ref_f32 = reference_forward_f32(x, params)
    # Tight check against the precision-matched reference (bf16 ops, fused 3+4).
    assert jnp.allclose(out, ref_matched, atol=1e-4, rtol=1e-3)
    # Loose semantic check against the pure-f32 PyTorch-equivalent forward
    # (differences come only from bf16 MXU operands + fp reassociation).
    assert jnp.allclose(out, ref_f32, atol=5e-2, rtol=5e-2)

    # Second check: non-divisible batch -> multi-tile grid + padding path.
    B2 = 200
    x2 = jax.random.normal(key_x2, (B2, IN), dtype=jnp.float32)
    out2 = jax.block_until_ready(simple_conv_net_forward(x2, params))
    assert out2.shape == (B2, 1)
    assert jnp.allclose(out2, reference_forward_matched(x2, params),
                        atol=1e-4, rtol=1e-3)

    print("KERNEL_OK")
</pallas_src>

<mosaic_0001>
module attributes {stable_mosaic.version = 11 : i64} {
  func.func @mlp_kernel(%arg0: i32, %arg1: memref<128x16xf32, #tpu.memory_space<vmem>>, %arg2: memref<64x16xbf16, #tpu.memory_space<vmem>>, %arg3: memref<128x64xbf16, #tpu.memory_space<vmem>>, %arg4: memref<128x4xf32, #tpu.memory_space<vmem>>, %arg5: memref<1x128xf32, #tpu.memory_space<vmem>>) attributes {dimension_semantics = [#tpu.dimension_semantics<parallel>], iteration_bounds = array<i64: 1>, scalar_prefetch = 0 : i64, scratch_operands = 0 : i64, tpu.core_type = #tpu.core_type<tc>, window_params = [{transform_indices = @transform_0, window_bounds = array<i64: 128, 16>}, {pipeline_mode = #tpu.pipeline_mode<synchronous>, transform_indices = @transform_1, window_bounds = array<i64: 64, 16>}, {pipeline_mode = #tpu.pipeline_mode<synchronous>, transform_indices = @transform_2, window_bounds = array<i64: 128, 64>}, {pipeline_mode = #tpu.pipeline_mode<synchronous>, transform_indices = @transform_3, window_bounds = array<i64: 128, 4>}, {transform_indices = @transform_4, window_bounds = array<i64: 1, 128>}]} {
    %c0 = arith.constant 0 : index
    %c0_0 = arith.constant 0 : index
    %0 = vector.load %arg1[%c0, %c0_0] : memref<128x16xf32, #tpu.memory_space<vmem>>, vector<128x16xf32>
    %1 = arith.truncf %0 : vector<128x16xf32> to vector<128x16xbf16>
    %c0_1 = arith.constant 0 : index
    %c0_2 = arith.constant 0 : index
    %2 = vector.load %arg4[%c0_1, %c0_2] : memref<128x4xf32, #tpu.memory_space<vmem>>, vector<64x1xf32>
    %c0_3 = arith.constant 0 : index
    %c1 = arith.constant 1 : index
    %3 = vector.load %arg4[%c0_3, %c1] : memref<128x4xf32, #tpu.memory_space<vmem>>, vector<128x1xf32>
    %c0_4 = arith.constant 0 : index
    %c2 = arith.constant 2 : index
    %4 = vector.load %arg4[%c0_4, %c2] : memref<128x4xf32, #tpu.memory_space<vmem>>, vector<128x1xf32>
    %c0_5 = arith.constant 0 : index
    %c3 = arith.constant 3 : index
    %5 = vector.load %arg4[%c0_5, %c3] : memref<128x4xf32, #tpu.memory_space<vmem>>, vector<1x1xf32>
    %c0_6 = arith.constant 0 : index
    %c0_7 = arith.constant 0 : index
    %6 = vector.load %arg2[%c0_6, %c0_7] : memref<64x16xbf16, #tpu.memory_space<vmem>>, vector<64x16xbf16>
    %cst = arith.constant dense<0.000000e+00> : vector<64x128xf32>
    %7 = tpu.matmul %6, %1, %cst {dimension_numbers = #tpu.dot_dimension_numbers<[1], [1], [0], [0], [0, 0, 1, 0], [], []>} : vector<64x16xbf16>, vector<128x16xbf16>, vector<64x128xf32> -> vector<64x128xf32>
    %8 = vector.broadcast %2 : vector<64x1xf32> to vector<64x128xf32>
    %9 = arith.addf %7, %8 : vector<64x128xf32>
    %cst_8 = arith.constant 0.000000e+00 : f32
    %10 = vector.broadcast %cst_8 : f32 to vector<64x128xf32>
    %11 = arith.maximumf %9, %10 : vector<64x128xf32>
    %c0_9 = arith.constant 0 : index
    %c0_10 = arith.constant 0 : index
    %12 = vector.load %arg3[%c0_9, %c0_10] : memref<128x64xbf16, #tpu.memory_space<vmem>>, vector<128x64xbf16>
    %13 = arith.truncf %11 : vector<64x128xf32> to vector<64x128xbf16>
    %cst_11 = arith.constant dense<0.000000e+00> : vector<128x128xf32>
    %14 = tpu.matmul %12, %13, %cst_11 {dimension_numbers = #tpu.dot_dimension_numbers<[1], [0], [0], [1], [0, 0, 1, 1], [], []>} : vector<128x64xbf16>, vector<64x128xbf16>, vector<128x128xf32> -> vector<128x128xf32>
    %15 = vector.broadcast %3 : vector<128x1xf32> to vector<128x128xf32>
    %16 = arith.addf %14, %15 : vector<128x128xf32>
    %cst_12 = arith.constant 0.000000e+00 : f32
    %17 = vector.broadcast %cst_12 : f32 to vector<128x128xf32>
    %18 = arith.maximumf %16, %17 : vector<128x128xf32>
    %19 = vector.broadcast %4 : vector<128x1xf32> to vector<128x128xf32>
    %20 = arith.mulf %18, %19 : vector<128x128xf32>
    %cst_13 = arith.constant dense<0.000000e+00> : vector<128xf32>
    %21 = vector.multi_reduction <add>, %20, %cst_13 [0] : vector<128x128xf32> to vector<128xf32>
    %22 = vector.shape_cast %21 : vector<128xf32> to vector<1x128xf32>
    %23 = vector.broadcast %5 : vector<1x1xf32> to vector<1x128xf32>
    %24 = arith.addf %22, %23 : vector<1x128xf32>
    %c0_14 = arith.constant 0 : index
    %c0_15 = arith.constant 0 : index
    %25 = vector.load %arg5[%c0_14, %c0_15] : memref<1x128xf32, #tpu.memory_space<vmem>>, vector<1x128xf32>
    tpu.vector_store %arg5[%c0_14, %c0_15], %24 {strides = array<i32>} : memref<1x128xf32, #tpu.memory_space<vmem>>, vector<1x128xf32>,
    return
  }
  func.func @transform_0(%arg0: i32) -> (i32, i32) {
    %c0_i32 = arith.constant 0 : i32
    %c0_i32_0 = arith.constant 0 : i32
    return %arg0, %c0_i32 : i32, i32
  }
  func.func @transform_1(%arg0: i32) -> (i32, i32) {
    %c0_i32 = arith.constant 0 : i32
    %c0_i32_0 = arith.constant 0 : i32
    %c0_i32_1 = arith.constant 0 : i32
    return %c0_i32, %c0_i32_0 : i32, i32
  }
  func.func @transform_2(%arg0: i32) -> (i32, i32) {
    %c0_i32 = arith.constant 0 : i32
    %c0_i32_0 = arith.constant 0 : i32
    %c0_i32_1 = arith.constant 0 : i32
    return %c0_i32, %c0_i32_0 : i32, i32
  }
  func.func @transform_3(%arg0: i32) -> (i32, i32) {
    %c0_i32 = arith.constant 0 : i32
    %c0_i32_0 = arith.constant 0 : i32
    %c0_i32_1 = arith.constant 0 : i32
    return %c0_i32, %c0_i32_0 : i32, i32
  }
  func.func @transform_4(%arg0: i32) -> (i32, i32) {
    %c0_i32 = arith.constant 0 : i32
    %c0_i32_0 = arith.constant 0 : i32
    return %c0_i32, %arg0 : i32, i32
  }
}

</mosaic_0001>

<bundles_post_ra>
// kernel: tpu_custom_call.1
= control target key start
LH: loop header
LB: loop body
LE: loop exit
PB: predicated region body
PF: predicated region fallthrough
CT: control target
= control target key end

     0   :  { %vm128_vm0 = vcmask 130048   ;;  %v789_v5 = vmov 0   ;;  %s1021_s0 = inlined_call_operand.vmem [shape: f32[128,16], index: 0, kind: input, shape index: {}]   ;;  %s1022_s1 = inlined_call_operand.vmem [shape: bf16[64,16], index: 1, kind: input, shape index: {}]   ;;  %s1023_s2 = inlined_call_operand.vmem [shape: bf16[128,64], index: 2, kind: input, shape index: {}]   ;;  %s1024_s3 = inlined_call_operand.vmem [shape: f32[128,4], index: 3, kind: input, shape index: {}]   ;;  %s1025_s4 = inlined_call_operand.hbm [shape: f32[1,128], index: 4, kind: output, shape index: {}]  }
   0x1   :  { %v33_v0 = vld [vmem:[%s1021_s0 + $0x70] sm:$0xff]  ;;  %v34_v1 = vld [vmem:[%s1021_s0 + $0x78] sm:$0xff]  ;;  %v31_v2 = vld [vmem:[%s1021_s0 + $0x60] sm:$0xff]  ;;  %739 = vset.pattern.permute.xlu0 %v789_v5  ;;  %740 = vset.pattern.permute.xlu1 %v789_v5 }
   0x2   :  { %v42_v3 = vpack.c.bf16 %v34_v1, %v33_v0  ;;  %v32_v4 = vld [vmem:[%s1021_s0 + $0x68] sm:$0xff]  ;;  %v29_v8 = vld [vmem:[%s1021_s0 + $0x50] sm:$0xff]  ;;  %v30_v9 = vld [vmem:[%s1021_s0 + $0x58] sm:$0xff] }
   0x3   :  { %v41_v6 = vpack.c.bf16 %v32_v4, %v31_v2  ;;  %v755_v10 = vld [vmem:[%s1022_s1] sm:$0xff]   ;;  %v40_v12 = vpack.c.bf16 %v30_v9, %v29_v8  ;;  %v848_v13 = vld [vmem:[%s1024_s3 + $0x30] sm:$0xff]  ;;  %v859_v15 = vld [vmem:[%s1024_s3 + $0x38] sm:$0xff] }
   0x4   :  { %726 = vmatprep.subr.msk.bf16.mxu0 %vm128_vm0, %v42_v3  ;;  %v163_v7 = vsel %vm128_vm0, %v42_v3, 0  ;;  %694 = vmatprep.mubr.msk.bf16.mxu0 %vm128_vm0, %v755_v10  ;;  %v854_v14 = vld [vmem:[%s1024_s3 + $0x20] sm:$0xff]  ;;  %v865_v16 = vld [vmem:[%s1024_s3 + $0x28] sm:$0xff]  ;;  %v877_v19 = vld [vmem:[%s1024_s3 + $0x10] sm:$0xff] }
   0x5   :  { %679 = vmatpush3.bf16.xpose.msra.mxu0 %v163_v7  ;;  %v160_v11 = vsel %vm128_vm0, %v41_v6, 0  ;;  %100 = vperm.xlu0 %739, %v848_v13   ;;  %v27_v17 = vld [vmem:[%s1021_s0 + $0x40] sm:$0xff]  ;;  %v28_v18 = vld [vmem:[%s1021_s0 + $0x48] sm:$0xff]  ;;  %v883_v20 = vld [vmem:[%s1024_s3 + $0x18] sm:$0xff]  ;;  %v157_v21 = vsel %vm128_vm0, %v40_v12, 0 }
   0x6   :  { %727 = vmatprep.subr.msk.bf16.mxu0 %vm128_vm0, %v41_v6  ;;  %90 = vperm.xlu1 %740, %v854_v14   ;;  %v39_v22 = vpack.c.bf16 %v28_v18, %v27_v17 }
   0x9   :  { %105 = vperm.xlu0 %739, %v859_v15  }
   0xa   :  { %95 = vperm.xlu1 %740, %v865_v16  }
   0xd   :  { %681 = vmatpush3.bf16.xpose.msra.mxu0 %v160_v11 }
   0xe   :  { %728 = vmatprep.subr.msk.bf16.mxu0 %vm128_vm0, %v40_v12 }
   0xf   :  { %9 = vsyncpa [#allocation3], 0  ;;  %80 = vperm.xlu0 %739, %v877_v19   ;;  %85 = vperm.xlu1 %740, %v883_v20   ;;  %v43_v23 = vld [vmem:[%s1024_s3] sm:$0xff]  ;;  %v44_v24 = vld [vmem:[%s1024_s3 + $0x8] sm:$0xff]  ;;  %v154_v27 = vsel %vm128_vm0, %v39_v22, 0  ;;  %vm370_vm1 = vcmask 523264  }
  0x10   :  { %v25_v25 = vld [vmem:[%s1021_s0 + $0x30] sm:$0xff]  ;;  %v26_v26 = vld [vmem:[%s1021_s0 + $0x38] sm:$0xff]  ;;  %v23_v29 = vld [vmem:[%s1021_s0 + $0x20] sm:$0xff]  ;;  %v790_v46 = vmov 1   ;;  %v791_v47 = vmov 2   ;;  %v792_v54 = vmov 3  }
  0x11   :  { %v38_v28 = vpack.c.bf16 %v26_v26, %v25_v25  ;;  %v24_v30 = vld [vmem:[%s1021_s0 + $0x28] sm:$0xff]  ;;  %v21_v33 = vld [vmem:[%s1021_s0 + $0x10] sm:$0xff]  ;;  %v22_v34 = vld [vmem:[%s1021_s0 + $0x18] sm:$0xff] }
  0x12   :  { %v37_v32 = vpack.c.bf16 %v24_v30, %v23_v29  ;;  %v36_v36 = vpack.c.bf16 %v22_v34, %v21_v33  ;;  %v19_v37 = vld [vmem:[%s1021_s0] sm:$0xff]  ;;  %v20_v38 = vld [vmem:[%s1021_s0 + $0x8] sm:$0xff]  ;;  %v757_v43 = vld [vmem:[%s1022_s1 + $0x10] sm:$0xff]  }
  0x13   :  { %70 = vperm.xlu0 %739, %v43_v23   ;;  %75 = vperm.xlu1 %740, %v44_v24   ;;  %v151_v31 = vsel %vm128_vm0, %v38_v28, 0  ;;  %v35_v40 = vpack.c.bf16 %v20_v38, %v19_v37  ;;  %v756_v42 = vld [vmem:[%s1022_s1 + $0x8] sm:$0xff]   ;;  %v758_v44 = vld [vmem:[%s1022_s1 + $0x18] sm:$0xff]   ;;  %v759_v45 = vld [vmem:[%s1023_s2] sm:$0xff]  }
  0x14   :  { %v148_v35 = vsel %vm128_vm0, %v37_v32, 0  ;;  %v145_v39 = vsel %vm128_vm0, %v36_v36, 0  ;;  %710 = vmatprep.mubr.msk.bf16.mxu1 %vm370_vm1, %v759_v45  ;;  %v51_v48 = vld [vmem:[%s1024_s3 + $0x40] sm:$0xff]  ;;  %v54_v49 = vld [vmem:[%s1024_s3 + $0x58] sm:$0xff]  ;;  %v52_v50 = vld [vmem:[%s1024_s3 + $0x48] sm:$0xff] }
  0x15   :  { %683 = vmatpush3.bf16.xpose.msra.mxu0 %v157_v21  ;;  %v142_v41 = vsel %vm128_vm0, %v35_v40, 0  ;;  %v55_v51 = vld [vmem:[%s1024_s3 + $0x60] sm:$0xff]  ;;  %v58_v52 = vld [vmem:[%s1024_s3 + $0x78] sm:$0xff]  ;;  %v53_v53 = vld [vmem:[%s1024_s3 + $0x50] sm:$0xff] }
  0x16   :  { %729 = vmatprep.subr.msk.bf16.mxu0 %vm128_vm0, %v39_v22  ;;  %v56_v55 = vld [vmem:[%s1024_s3 + $0x68] sm:$0xff]  ;;  %v57_v56 = vld [vmem:[%s1024_s3 + $0x70] sm:$0xff]  ;;  %v59_v61 = vld [vmem:[%s1024_s3] sm:$0x1] }
  0x17   :  { %742 = vset.pattern.permute.xlu1 %v790_v46  ;;  %741 = vset.pattern.permute.xlu0 %v790_v46  ;;  %v760_v30 = vld [vmem:[%s1023_s2 + $0x8] sm:$0xff]   ;;  %v763_v33 = vld [vmem:[%s1023_s2 + $0x20] sm:$0xff]  }
  0x18   :  { %263 = vperm.xlu1 %742, %v44_v24   ;;  %259 = vperm.xlu0 %741, %v43_v23   ;;  %v764_v34 = vld [vmem:[%s1023_s2 + $0x28] sm:$0xff]  }
  0x1c   :  { %267 = vperm.xlu1 %742, %v877_v19   ;;  %271 = vperm.xlu0 %741, %v883_v20  }
  0x1d   :  { %685 = vmatpush3.bf16.xpose.msra.mxu0 %v154_v27 }
  0x1e   :  { %730 = vmatprep.subr.msk.bf16.mxu0 %vm128_vm0, %v38_v28 }
  0x20   :  { %275 = vperm.xlu1 %742, %v854_v14   ;;  %279 = vperm.xlu0 %741, %v865_v16  }
  0x24   :  { %743 = vset.pattern.permute.xlu1 %v791_v47  ;;  %283 = vperm.xlu0 %741, %v848_v13  }
  0x25   :  { %687 = vmatpush3.bf16.xpose.msra.mxu0 %v151_v31  ;;  %509 = vperm.xlu1 %743, %v43_v23   ;;  %v761_v31 = vld [vmem:[%s1023_s2 + $0x10] sm:$0xff]  }
  0x26   :  { %731 = vmatprep.subr.msk.bf16.mxu0 %vm128_vm0, %v37_v32  ;;  %v762_v32 = vld [vmem:[%s1023_s2 + $0x18] sm:$0xff]  }
  0x28   :  { %744 = vset.pattern.permute.xlu0 %v791_v47 }
  0x29   :  { %517 = vperm.xlu1 %743, %v877_v19   ;;  %513 = vperm.xlu0 %744, %v44_v24  }
  0x2d   :  { %689 = vmatpush3.bf16.xpose.msra.mxu0 %v148_v35  ;;  %521 = vperm.xlu1 %743, %v883_v20   ;;  %v765_v35 = vld [vmem:[%s1023_s2 + $0x30] sm:$0xff]  }
  0x2e   :  { %732 = vmatprep.subr.msk.bf16.mxu0 %vm128_vm0, %v36_v36  ;;  %529 = vperm.xlu0 %744, %v865_v16   ;;  %v766_v36 = vld [vmem:[%s1023_s2 + $0x38] sm:$0xff]   ;;  %s793_s2 = smov [#allocation2]  }
  0x2f   :  { %s622_s22 = sshll.u32 %s793_s2, 4  ;;  %s623_s22 = int_to_ptr.vmem [resolvable:$true] %s622_s22 }
  0x30   :  { %s767_s23 = scalar_lea.vmem %s623_s22, 16  ;;  %s771_s24 = scalar_lea.vmem %s623_s22, 32 }
  0x31   :  { %525 = vperm.xlu1 %743, %v854_v14   ;;  %p768_p0 = scmp.ne.s32.totalorder %s623_s22, %s767_s23  ;;  %p772_p1 = scmp.lt.s32.totalorder %s623_s22, %s623_s22 }
  0x32   :  { %541 = vperm.xlu0 %744, %v51_v48   ;;  %p773_p2 = scmp.lt.s32.totalorder %s771_s24, %s767_s23 }
  0x34   :  { %p774_p3 = por %p773_p2, %p772_p1 }
  0x35   :  { %691 = vmatpush3.bf16.xpose.msra.mxu0 %v145_v39  ;;  %745 = vset.pattern.permute.xlu1 %v790_v46 }
  0x36   :  { %733 = vmatprep.subr.msk.bf16.mxu0 %vm128_vm0, %v35_v40  ;;  %553 = vperm.xlu0 %744, %v54_v49   ;;  %p775_p4 = pnand %p774_p3, %p768_p0 }
  0x37   :  { %287 = vperm.xlu1 %745, %v859_v15  }
  0x3a   :  { %750 = vset.pattern.permute.xlu0 %v790_v46 }
  0x3b   :  { %292 = vperm.xlu1 %745, %v51_v48   ;;  %297 = vperm.xlu0 %750, %v52_v50  }
  0x3d   :  { %693 = vmatpush3.bf16.xpose.msra.mxu0 %v142_v41 }
  0x3f   :  { %746 = vset.pattern.permute.xlu1 %v791_v47  ;;  %312 = vperm.xlu0 %750, %v55_v51  }
  0x40   :  { %533 = vperm.xlu1 %746, %v848_v13  }
  0x43   :  { %327 = vperm.xlu0 %750, %v58_v52  }
  0x44   :  { %695 = vmatmul.mubr.msk.bf16.vlgmr.msra.gmra.mxu0 %vm128_vm0, %v756_v42  ;;  %537 = vperm.xlu1 %746, %v859_v15  }
  0x45   :  { %698 = vmatprep.mubr.msk.bf16.mxu0 %vm128_vm0, %v757_v43 }
  0x47   :  { %752 = vset.pattern.permute.xlu0 %v791_v47 }
  0x48   :  { %747 = vset.pattern.permute.xlu1 %v790_v46  ;;  %569 = vperm.xlu0 %752, %v58_v52  }
  0x49   :  { %302 = vperm.xlu1 %747, %v53_v53  }
  0x4c   :  { %699 = vmatmul.mubr.msk.bf16.gmra.mxu0 %vm128_vm0, %v758_v44  ;;  %754 = vset.pattern.permute.xlu0 %v792_v54 }
  0x4d   :  { %307 = vperm.xlu1 %747, %v54_v49  }
  0x51   :  { %748 = vset.pattern.permute.xlu1 %v791_v47 }
  0x52   :  { %545 = vperm.xlu1 %748, %v52_v50  }
  0x56   :  { %549 = vperm.xlu1 %748, %v53_v53  }
  0x5a   :  { %749 = vset.pattern.permute.xlu1 %v790_v46 }
  0x5b   :  { %317 = vperm.xlu1 %749, %v56_v55  }
  0x5f   :  { %322 = vperm.xlu1 %749, %v57_v56  }
  0x63   :  { %751 = vset.pattern.permute.xlu1 %v791_v47 }
  0x64   :  { %557 = vperm.xlu1 %751, %v55_v51  }
  0x68   :  { %561 = vperm.xlu1 %751, %v56_v55  }
  0x6c   :  { %565 = vperm.xlu1 %751, %v57_v56  }
  0x70   :  { %753 = vset.pattern.permute.xlu1 %v792_v54 }
  0x71   :  { %611 = vperm.xlu1 %753, %v59_v61  }
  0x80   :  { %v101_v58 = vpop.permute.xlu0 %100 }
  0x81   :  { %v91_v57 = vpop.permute.xlu1 %90 }
  0x84   :  { %v106_v0 = vpop.permute.xlu0 %105 }
  0x85   :  { %v96_v62 = vpop.permute.xlu1 %95 }
  0x8a   :  { %v86_v3 = vpop.permute.xlu1 %85  ;;  %v81_v6 = vpop.permute.xlu0 %80 }
  0x8e   :  { %v76_v15 = vpop.permute.xlu1 %75  ;;  %v71_v20 = vpop.permute.xlu0 %70 }
  0x93   :  { %v264_v37 = vpop.permute.xlu1 %263  ;;  %v260_v46 = vpop.permute.xlu0 %259 }
  0x97   :  { %v268_v38 = vpop.permute.xlu1 %267  ;;  %v272_v48 = vpop.permute.xlu0 %271 }
  0x9b   :  { %v276_v39 = vpop.permute.xlu1 %275  ;;  %v280_v50 = vpop.permute.xlu0 %279 }
  0x9f   :  { %v284_v52 = vpop.permute.xlu0 %283 }
  0xa0   :  { %v510_v40 = vpop.permute.xlu1 %509 }
  0xa4   :  { %v518_v41 = vpop.permute.xlu1 %517  ;;  %v514_v54 = vpop.permute.xlu0 %513 }
  0xa8   :  { %v522_v42 = vpop.permute.xlu1 %521 }
  0xac   :  { %v526_v43 = vpop.permute.xlu1 %525 }
  0xb2   :  { %v288_v44 = vpop.permute.xlu1 %287 }
  0xb6   :  { %v293_v45 = vpop.permute.xlu1 %292 }
  0xbb   :  { %v534_v47 = vpop.permute.xlu1 %533 }
  0xbf   :  { %v538_v49 = vpop.permute.xlu1 %537 }
  0xc4   :  { %v303_v51 = vpop.permute.xlu1 %302 }
  0xc8   :  { %v308_v53 = vpop.permute.xlu1 %307 }
  0xcd   :  { %v1012_v55 = vpop.permute.xlu1 %545 }
  0xd1   :  { %v1014_v61 = vpop.permute.xlu1 %549 }
 0x104   :  { %v696_v59 = vpop.f32.mrf.mxu0 }
 0x105   :  { %v208_v16 = vadd.f32 %v696_v59, %v81_v6 }
 0x106   :  { %v199_v60 = vpop.f32.mrf.mxu0 }
 0x107   :  { %v232_v24 = vmax.f32 %v208_v16, 0.0  ;;  %v200_v25 = vadd.f32 %v199_v60, %v71_v20 }
 0x108   :  { %v697_v63 = vpop.f32.mrf.mxu0 }
 0x109   :  { %v211_v11 = vadd.f32 %v697_v63, %v86_v3  ;;  %v230_v28 = vmax.f32 %v200_v25, 0.0 }
 0x10a   :  { %v202_v1 = vpop.f32.mrf.mxu0 }
 0x10b   :  { %v233_v21 = vmax.f32 %v211_v11, 0.0  ;;  %v203_v22 = vadd.f32 %v202_v1, %v76_v15 }
 0x10c   :  { %v700_v2 = vpop.f32.mrf.mxu0 }
 0x10d   :  { %v224_v5 = vadd.f32 %v700_v2, %v101_v58  ;;  %v255_v26 = vpack.c.bf16 %v233_v21, %v232_v24  ;;  %v231_v27 = vmax.f32 %v203_v22, 0.0 }
 0x10e   :  { %v215_v4 = vpop.f32.mrf.mxu0 }
 0x10f   :  { %v216_v8 = vadd.f32 %v215_v4, %v91_v57  ;;  %v236_v12 = vmax.f32 %v224_v5, 0.0  ;;  %v254_v29 = vpack.c.bf16 %v231_v27, %v230_v28  ;;  %v530_v57 = vpop.permute.xlu0 %529 }
 0x110   :  { %v701_v7 = vpop.f32.mrf.mxu0 }
 0x111   :  { %v227_v9 = vadd.f32 %v701_v7, %v106_v0  ;;  %v234_v17 = vmax.f32 %v216_v8, 0.0  ;;  %v318_v8 = vpop.permute.xlu1 %317 }
 0x112   :  { %v218_v10 = vpop.f32.mrf.mxu0 }
 0x113   :  { %v237_v13 = vmax.f32 %v227_v9, 0.0  ;;  %v219_v14 = vadd.f32 %v218_v10, %v96_v62  ;;  %v542_v3 = vpop.permute.xlu0 %541 }
 0x115   :  { %v235_v18 = vmax.f32 %v219_v14, 0.0  ;;  %v257_v19 = vpack.c.bf16 %v237_v13, %v236_v12  ;;  %v323_v24 = vpop.permute.xlu1 %322 }
 0x117   :  { %v256_v23 = vpack.c.bf16 %v235_v18, %v234_v17  ;;  %702 = vmatprep.subr.bf16.mxu1 %v257_v19  ;;  %v554_v18 = vpop.permute.xlu0 %553 }
 0x118   :  { %703 = vmatpush3.bf16.msra.mxu1 %v257_v19 }
 0x119   :  { %704 = vmatprep.subr.bf16.mxu1 %v256_v23 }
 0x11c   :  { %705 = vmatpush3.bf16.msra.mxu1 %v256_v23 }
 0x11d   :  { %706 = vmatprep.subr.bf16.mxu1 %v255_v26 }
 0x120   :  { %707 = vmatpush3.bf16.msra.mxu1 %v255_v26 }
 0x121   :  { %708 = vmatprep.subr.bf16.mxu1 %v254_v29 }
 0x124   :  { %709 = vmatpush3.bf16.msra.mxu1 %v254_v29 }
 0x127   :  { %711 = vmatmul.mubr.msk.bf16.vlgmr.msra.gmra.mxu1 %vm370_vm1, %v760_v30  ;;  %v298_v30 = vpop.permute.xlu0 %297 }
 0x128   :  { %714 = vmatprep.mubr.msk.bf16.mxu1 %vm370_vm1, %v761_v31 }
 0x12f   :  { %715 = vmatmul.mubr.msk.bf16.gmra.mxu1 %vm370_vm1, %v762_v32 }
 0x130   :  { %718 = vmatprep.mubr.msk.bf16.mxu1 %vm370_vm1, %v763_v33 }
 0x137   :  { %719 = vmatmul.mubr.msk.bf16.gmra.mxu1 %vm370_vm1, %v764_v34 }
 0x138   :  { %722 = vmatprep.mubr.msk.bf16.mxu1 %vm370_vm1, %v765_v35 }
 0x13f   :  { %723 = vmatmul.mubr.msk.bf16.gmra.mxu1 %vm370_vm1, %v766_v36 }
 0x1e7   :  { %v712_v56 = vpop.f32.mrf.mxu1 }
 0x1e8   :  { %v438_v62 = vadd.f32 %v712_v56, %v268_v38 }
 0x1e9   :  { %v429_v58 = vpop.f32.mrf.mxu1 }
 0x1ea   :  { %v430_v59 = vadd.f32 %v429_v58, %v260_v46  ;;  %v494_v5 = vmax.f32 %v438_v62, 0.0 }
 0x1eb   :  { %v713_v60 = vpop.f32.mrf.mxu1 }
 0x1ec   :  { %v492_v0 = vmax.f32 %v430_v59, 0.0  ;;  %v441_v1 = vadd.f32 %v713_v60, %v272_v48  ;;  %v574_v14 = vmul.f32 %v518_v41, %v494_v5  ;;  %v558_v41 = vpop.permute.xlu1 %557 }
 0x1ed   :  { %v432_v63 = vpop.f32.mrf.mxu1 }
 0x1ee   :  { %v433_v2 = vadd.f32 %v432_v63, %v264_v37  ;;  %v572_v9 = vmul.f32 %v510_v40, %v492_v0  ;;  %v495_v10 = vmax.f32 %v441_v1, 0.0 }
 0x1ef   :  { %v716_v4 = vpop.f32.mrf.mxu1 }
 0x1f0   :  { %v493_v6 = vmax.f32 %v433_v2, 0.0  ;;  %v454_v16 = vadd.f32 %v716_v4, %v284_v52  ;;  %v575_v20 = vmul.f32 %v522_v42, %v495_v10 }
 0x1f1   :  { %v445_v7 = vpop.f32.mrf.mxu1 }
 0x1f2   :  { %v573_v11 = vmul.f32 %v514_v54, %v493_v6  ;;  %v446_v12 = vadd.f32 %v445_v7, %v276_v39  ;;  %v498_v26 = vmax.f32 %v454_v16, 0.0 }
 0x1f3   :  { %v717_v13 = vpop.f32.mrf.mxu1 }
 0x1f4   :  { %v588_v15 = vadd.f32 %v573_v11, %v572_v9  ;;  %v496_v17 = vmax.f32 %v446_v12, 0.0  ;;  %v457_v22 = vadd.f32 %v717_v13, %v288_v44  ;;  %v578_v37 = vmul.f32 %v534_v47, %v498_v26 }
 0x1f5   :  { %v448_v19 = vpop.f32.mrf.mxu1 }
 0x1f6   :  { %v589_v21 = vadd.f32 %v588_v15, %v574_v14  ;;  %v449_v23 = vadd.f32 %v448_v19, %v280_v50  ;;  %v576_v27 = vmul.f32 %v526_v43, %v496_v17  ;;  %v499_v33 = vmax.f32 %v457_v22, 0.0  ;;  %v313_v43 = vpop.permute.xlu0 %312 }
 0x1f7   :  { %v720_v25 = vpop.f32.mrf.mxu1 }
 0x1f8   :  { %v590_v28 = vadd.f32 %v589_v21, %v575_v20  ;;  %v497_v29 = vmax.f32 %v449_v23, 0.0  ;;  %v470_v39 = vadd.f32 %v720_v25, %v303_v51  ;;  %v579_v44 = vmul.f32 %v538_v49, %v499_v33  ;;  %v562_v51 = vpop.permute.xlu1 %561 }
 0x1f9   :  { %v461_v31 = vpop.f32.mrf.mxu1 }
 0x1fa   :  { %v591_v32 = vadd.f32 %v590_v28, %v576_v27  ;;  %v577_v34 = vmul.f32 %v530_v57, %v497_v29  ;;  %v462_v35 = vadd.f32 %v461_v31, %v293_v45  ;;  %v502_v54 = vmax.f32 %v470_v39, 0.0  ;;  %v328_v2 = vpop.permute.xlu0 %327 }
 0x1fb   :  { %v721_v36 = vpop.f32.mrf.mxu1 }
 0x1fc   :  { %v592_v38 = vadd.f32 %v591_v32, %v577_v34  ;;  %v500_v40 = vmax.f32 %v462_v35, 0.0  ;;  %v473_v48 = vadd.f32 %v721_v36, %v308_v53  ;;  %v582_v0 = vmul.f32 %v1014_v61, %v502_v54  ;;  %v566_v13 = vpop.permute.xlu1 %565 }
 0x1fd   :  { %v464_v42 = vpop.f32.mrf.mxu1 }
 0x1fe   :  { %v593_v46 = vadd.f32 %v592_v38, %v578_v37  ;;  %v465_v50 = vadd.f32 %v464_v42, %v298_v30  ;;  %v580_v56 = vmul.f32 %v542_v3, %v500_v40  ;;  %v503_v45 = vmax.f32 %v473_v48, 0.0  ;;  %v570_v16 = vpop.permute.xlu0 %569 }
 0x1ff   :  { %v724_v52 = vpop.f32.mrf.mxu1 }
 0x200   :  { %v594_v58 = vadd.f32 %v593_v46, %v579_v44  ;;  %v501_v59 = vmax.f32 %v465_v50, 0.0  ;;  %v486_v1 = vadd.f32 %v724_v52, %v323_v24  ;;  %v583_v5 = vmul.f32 %v554_v18, %v503_v45 }
 0x201   :  { %v477_v60 = vpop.f32.mrf.mxu1 }
 0x202   :  { %v595_v57 = vadd.f32 %v594_v58, %v580_v56  ;;  %v581_v47 = vmul.f32 %v1012_v55, %v501_v59  ;;  %v478_v62 = vadd.f32 %v477_v60, %v313_v43  ;;  %v506_v9 = vmax.f32 %v486_v1, 0.0 }
 0x203   :  { %v725_v63 = vpop.f32.mrf.mxu1 }
 0x204   :  { %v596_v49 = vadd.f32 %v595_v57, %v581_v47  ;;  %v504_v53 = vmax.f32 %v478_v62, 0.0  ;;  %v489_v3 = vadd.f32 %v725_v63, %v328_v2  ;;  %v586_v17 = vmul.f32 %v566_v13, %v506_v9 }
 0x205   :  { %v480_v4 = vpop.f32.mrf.mxu1 }
 0x206   :  { %v597_v6 = vadd.f32 %v596_v49, %v582_v0  ;;  %v481_v7 = vadd.f32 %v480_v4, %v318_v8  ;;  %v584_v10 = vmul.f32 %v558_v41, %v504_v53  ;;  %v507_v14 = vmax.f32 %v489_v3, 0.0  ;;  %v612_v8 = vpop.permute.xlu1 %611 }
 0x208   :  { %v598_v11 = vadd.f32 %v597_v6, %v583_v5  ;;  %v505_v12 = vmax.f32 %v481_v7, 0.0  ;;  %v587_v19 = vmul.f32 %v570_v16, %v507_v14 }
 0x20a   :  { %v599_v55 = vadd.f32 %v598_v11, %v584_v10  ;;  %v585_v15 = vmul.f32 %v562_v51, %v505_v12 }
 0x20c   :  { %v600_v61 = vadd.f32 %v599_v55, %v585_v15 }
 0x20e   :  { %v601_v20 = vadd.f32 %v600_v61, %v586_v17 }
 0x210   :  { %v602_v21 = vadd.f32 %v601_v20, %v587_v19 }
 0x212   :  { %v603_v22 = vrot.slane %v602_v21, 4 }
 0x214   :  { %v604_v23 = vadd.f32 %v603_v22, %v602_v21 }
 0x216   :  { %v605_v18 = vrot.slane %v604_v23, 2 }
 0x218   :  { %v606_v24 = vadd.f32 %v605_v18, %v604_v23 }
 0x21a   :  { %v607_v25 = vrot.slane %v606_v24, 1 }
 0x21c   :  { %v608_v26 = vadd.f32 %v607_v25, %v606_v24 }
 0x21e   :  { %v614_v27 = vadd.f32 %v612_v8, %v608_v26 }
 0x220   :  { %615 = vst [vmem:[#allocation2] sm:$0x1] %v614_v27 }
 0x221   :  { %778 = shalt.err (!%p775_p4)
}
 0x222   :  { %625 = dma.vmem_to_hbm [thread:$0]  %s623_s22, 16, %s1025_s4, [#allocation3]  }
 0x223   :  { %787 = dma.done.wait [#allocation3], 16  }
 0x224   :  { %788 = vsyncadd [#allocation3], 4294967280 }
 0x225   :  { %629 = vsyncpa [#allocation3], 1 }

</bundles_post_ra>
